<compile_context>
chip_gen: v5e
topology: v5e:2x2
jax: 0.10.0
libtpu: 0.0.40
codegen_flags: <defaults>
</compile_context>

<pallas_src>
import numpy as np

import jax
import jax.numpy as jnp
from jax.experimental import pallas as pl
from jax.experimental.pallas import tpu as pltpu


LANE = 128


def _round_up(x, m):
    return ((x + m - 1) // m) * m


def _vmem_spec():
    return pl.BlockSpec(memory_space=pltpu.MemorySpace.VMEM)


# ---------------- fused Pallas kernel ----------------

def fused_gnn_kernel(a_ref, x0_ref, wl_ref, wr_ref, b_ref, p_ref,
                     wlin_ref, blin_ref, o_ref, h_ref):
    """All SAGE layers + global_mean_pool + Linear, fully VMEM-resident.

    a_ref   : (N_pad, N_pad) bf16  row-normalized mean adjacency
    x0_ref  : (N_pad, H_pad) bf16  zero-padded node features
    wl_ref  : (L, H_pad, H_pad) bf16  lin_l weights (padded)
    wr_ref  : (L, H_pad, H_pad) bf16  lin_r weights (padded)
    b_ref   : (L, 1, H_pad) f32       lin_l biases (padded)
    p_ref   : (G_pad, N_pad) bf16     mean-pool matrix
    wlin_ref: (H_pad, OUT_PAD) bf16   final Linear weight (col 0 used)
    blin_ref: (1, OUT_PAD) f32        final Linear bias
    o_ref   : (G_pad, OUT_PAD) f32    output (lane-dense)
    h_ref   : (N_pad, H_pad) bf16     VMEM scratch keeping activations resident
    """
    a = a_ref[...]
    x = x0_ref[...]
    num_layers = wl_ref.shape[0]
    for l in range(num_layers):
        # mean aggregation over incoming neighbors: agg = A @ x   (MXU, f32 acc)
        agg = jnp.dot(a, x, preferred_element_type=jnp.float32)
        # SAGEConv: lin_l(agg) + lin_r(x) + b_l, then ReLU
        h = jnp.dot(agg.astype(jnp.bfloat16), wl_ref[l],
                    preferred_element_type=jnp.float32)
        h = h + jnp.dot(x, wr_ref[l], preferred_element_type=jnp.float32)
        h = h + b_ref[l]                      # (1, H_pad) broadcasts over nodes
        h_ref[...] = jnp.maximum(h, 0.0).astype(h_ref.dtype)
        x = h_ref[...]                        # stays in VMEM between layers
    # epilogue: global_mean_pool (G_pad, N_pad)@(N_pad, H_pad) + Linear(H, 1)
    pooled = jnp.dot(p_ref[...], x, preferred_element_type=jnp.float32)
    out = jnp.dot(pooled.astype(jnp.bfloat16), wlin_ref[...],
                  preferred_element_type=jnp.float32)
    o_ref[...] = out + blin_ref[...]


def gnn_sage_fused(a, x0, wl, wr, b, p, wlin, blin):
    n_pad, h_pad = x0.shape
    g_pad = p.shape[0]
    out_pad = wlin.shape[1]
    num_layers = wl.shape[0]

    flops = (num_layers * (2 * n_pad * n_pad * h_pad          # A @ x
                           + 2 * 2 * n_pad * h_pad * h_pad)   # two weight matmuls
             + 2 * g_pad * n_pad * h_pad                      # pooling
             + 2 * g_pad * h_pad * out_pad)                   # final Linear
    inputs = (a, x0, wl, wr, b, p, wlin, blin)
    bytes_accessed = (sum(int(t.size) * t.dtype.itemsize for t in inputs)
                      + g_pad * out_pad * 4)

    return pl.pallas_call(
        fused_gnn_kernel,
        out_shape=jax.ShapeDtypeStruct((g_pad, out_pad), jnp.float32),
        in_specs=[_vmem_spec()] * 8,
        out_specs=_vmem_spec(),
        scratch_shapes=[pltpu.VMEM((n_pad, h_pad), jnp.bfloat16)],
        compiler_params=pltpu.CompilerParams(
            vmem_limit_bytes=32 * 1024 * 1024),
        cost_estimate=pl.CostEstimate(
            flops=flops, transcendentals=0, bytes_accessed=bytes_accessed),
    )(a, x0, wl, wr, b, p, wlin, blin)


# -------- graph-structure / parameter precompute (hoisted out of forward) ----

def build_mean_adj(edge_index, num_nodes, n_pad):
    # A[t, s] = 1/deg_in(t) for each edge s -> t (PyG mean aggregation).
    src, dst = edge_index[0], edge_index[1]
    a = jnp.zeros((n_pad, n_pad), jnp.float32)
    a = a.at[dst, src].add(1.0)
    deg = a.sum(axis=1, keepdims=True)
    a = a / jnp.maximum(deg, 1.0)
    return a.astype(jnp.bfloat16)


def build_mean_pool(batch, num_nodes, g_pad, n_pad):
    p = jnp.zeros((g_pad, n_pad), jnp.float32)
    p = p.at[batch, jnp.arange(num_nodes)].add(1.0)
    cnt = p.sum(axis=1, keepdims=True)
    p = p / jnp.maximum(cnt, 1.0)
    return p.astype(jnp.bfloat16)


def pad_features(x, n_pad, h_pad):
    n, f = x.shape
    xp = jnp.zeros((n_pad, h_pad), jnp.float32).at[:n, :f].set(x)
    return xp.astype(jnp.bfloat16)


def init_params(key, num_features, hidden_channels, num_layers):
    params = {"convs": []}
    in_dim = num_features
    for _ in range(num_layers):
        key, k1, k2 = jax.random.split(key, 3)
        scale = 1.0 / jnp.sqrt(jnp.float32(in_dim))
        w_l = jax.random.normal(k1, (in_dim, hidden_channels), jnp.float32) * scale
        w_r = jax.random.normal(k2, (in_dim, hidden_channels), jnp.float32) * scale
        b_l = jnp.zeros((1, hidden_channels), jnp.float32)
        params["convs"].append((w_l, b_l, w_r))
        in_dim = hidden_channels
    key, k3 = jax.random.split(key)
    params["lin_w"] = (jax.random.normal(k3, (hidden_channels, 1), jnp.float32)
                       / jnp.sqrt(jnp.float32(hidden_channels)))
    params["lin_b"] = jnp.zeros((1, 1), jnp.float32)
    return params


def prepare_params(params, h_pad, out_pad):
    """Zero-pad weights to lane-dense (H_pad) widths, stack per layer, cast bf16."""
    wl_list, wr_list, b_list = [], [], []
    for (w_l, b_l, w_r) in params["convs"]:
        in_dim, out_dim = w_l.shape
        wl_p = jnp.zeros((h_pad, h_pad), jnp.float32).at[:in_dim, :out_dim].set(w_l)
        wr_p = jnp.zeros((h_pad, h_pad), jnp.float32).at[:in_dim, :out_dim].set(w_r)
        b_p = jnp.zeros((1, h_pad), jnp.float32).at[:, :out_dim].set(b_l)
        wl_list.append(wl_p)
        wr_list.append(wr_p)
        b_list.append(b_p)
    wl = jnp.stack(wl_list).astype(jnp.bfloat16)          # (L, H_pad, H_pad)
    wr = jnp.stack(wr_list).astype(jnp.bfloat16)          # (L, H_pad, H_pad)
    b = jnp.stack(b_list)                                  # (L, 1, H_pad) f32
    hid = params["lin_w"].shape[0]
    wlin = (jnp.zeros((h_pad, out_pad), jnp.float32)
            .at[:hid, :1].set(params["lin_w"])).astype(jnp.bfloat16)
    blin = jnp.zeros((1, out_pad), jnp.float32).at[:, :1].set(params["lin_b"])
    return wl, wr, b, wlin, blin


# ---------------- pure-JAX f32 reference (for a loose correctness check) -----

def reference_forward(params, x, edge_index, batch, num_graphs):
    n = x.shape[0]
    src, dst = edge_index[0], edge_index[1]
    a = jnp.zeros((n, n), jnp.float32).at[dst, src].add(1.0)
    a = a / jnp.maximum(a.sum(axis=1, keepdims=True), 1.0)
    h = x
    for (w_l, b_l, w_r) in params["convs"]:
        h = jnp.maximum((a @ h) @ w_l + h @ w_r + b_l, 0.0)
    p = jnp.zeros((num_graphs, n), jnp.float32).at[batch, jnp.arange(n)].add(1.0)
    p = p / jnp.maximum(p.sum(axis=1, keepdims=True), 1.0)
    pooled = p @ h
    return (pooled @ params["lin_w"] + params["lin_b"])[:, 0]


if __name__ == "__main__":
    key = jax.random.PRNGKey(0)

    num_features = 4
    hidden_channels = 32
    num_layers = 2
    num_nodes = 16
    num_edges = 40
    num_graphs = 2

    n_pad = _round_up(num_nodes, LANE)
    h_pad = _round_up(max(hidden_channels, num_features), LANE)
    g_pad = _round_up(num_graphs, 8)
    out_pad = LANE

    key, kx, ke = jax.random.split(key, 3)
    x = jax.random.normal(kx, (num_nodes, num_features), jnp.float32)
    edge_index = jax.random.randint(ke, (2, num_edges), 0, num_nodes, jnp.int32)
    # first 8 nodes -> graph 0, last 8 -> graph 1
    batch = jnp.concatenate(
        [jnp.zeros((8,), jnp.int32), jnp.ones((8,), jnp.int32)]
    )

    params = init_params(key, num_features, hidden_channels, num_layers)

    # Hoisted precompute (once per graph/batch, cached across forwards).
    a = build_mean_adj(edge_index, num_nodes, n_pad)
    p = build_mean_pool(batch, num_nodes, g_pad, n_pad)
    wl, wr, b, wlin, blin = prepare_params(params, h_pad, out_pad)
    x0 = pad_features(x, n_pad, h_pad)

    forward = jax.jit(gnn_sage_fused)
    out_full = jax.block_until_ready(forward(a, x0, wl, wr, b, p, wlin, blin))
    out = out_full[:num_graphs, 0]            # .squeeze(-1) -> (num_graphs,)

    ref = reference_forward(params, x, edge_index, batch, num_graphs)
    np.testing.assert_allclose(np.asarray(out), np.asarray(ref),
                               rtol=0.1, atol=0.05)  # bf16 drift tolerance
    assert out.shape == (num_graphs,)
    print("KERNEL_OK")
</pallas_src>

<mosaic_0001>
module attributes {stable_mosaic.version = 11 : i64} {
  func.func @fused_gnn_kernel(%arg0: memref<128x128xbf16, #tpu.memory_space<vmem>>, %arg1: memref<128x128xbf16, #tpu.memory_space<vmem>>, %arg2: memref<2x128x128xbf16, #tpu.memory_space<vmem>>, %arg3: memref<2x128x128xbf16, #tpu.memory_space<vmem>>, %arg4: memref<2x1x128xf32, #tpu.memory_space<vmem>>, %arg5: memref<8x128xbf16, #tpu.memory_space<vmem>>, %arg6: memref<128x128xbf16, #tpu.memory_space<vmem>>, %arg7: memref<1x128xf32, #tpu.memory_space<vmem>>, %arg8: memref<8x128xf32, #tpu.memory_space<vmem>>, %arg9: memref<128x128xbf16, #tpu.memory_space<vmem>>) attributes {dimension_semantics = [], scalar_prefetch = 0 : i64, scratch_operands = 1 : i64, tpu.core_type = #tpu.core_type<tc>} {
    %c0 = arith.constant 0 : index
    %c0_0 = arith.constant 0 : index
    %0 = vector.load %arg0[%c0, %c0_0] : memref<128x128xbf16, #tpu.memory_space<vmem>>, vector<128x128xbf16>
    %c0_1 = arith.constant 0 : index
    %c0_2 = arith.constant 0 : index
    %1 = vector.load %arg1[%c0_1, %c0_2] : memref<128x128xbf16, #tpu.memory_space<vmem>>, vector<128x128xbf16>
    %cst = arith.constant dense<0.000000e+00> : vector<128x128xf32>
    %2 = tpu.matmul %0, %1, %cst {dimension_numbers = #tpu.dot_dimension_numbers<[1], [0], [0], [1], [0, 0, 1, 1], [], []>} : vector<128x128xbf16>, vector<128x128xbf16>, vector<128x128xf32> -> vector<128x128xf32>
    %3 = arith.truncf %2 : vector<128x128xf32> to vector<128x128xbf16>
    %c0_3 = arith.constant 0 : index
    %c0_4 = arith.constant 0 : index
    %c0_5 = arith.constant 0 : index
    %4 = vector.load %arg2[%c0_3, %c0_4, %c0_5] : memref<2x128x128xbf16, #tpu.memory_space<vmem>>, vector<1x128x128xbf16>
    %5 = vector.shape_cast %4 : vector<1x128x128xbf16> to vector<128x128xbf16>
    %cst_6 = arith.constant dense<0.000000e+00> : vector<128x128xf32>
    %6 = tpu.matmul %3, %5, %cst_6 {dimension_numbers = #tpu.dot_dimension_numbers<[1], [0], [0], [1], [0, 0, 1, 1], [], []>} : vector<128x128xbf16>, vector<128x128xbf16>, vector<128x128xf32> -> vector<128x128xf32>
    %c0_7 = arith.constant 0 : index
    %c0_8 = arith.constant 0 : index
    %c0_9 = arith.constant 0 : index
    %7 = vector.load %arg3[%c0_7, %c0_8, %c0_9] : memref<2x128x128xbf16, #tpu.memory_space<vmem>>, vector<1x128x128xbf16>
    %8 = vector.shape_cast %7 : vector<1x128x128xbf16> to vector<128x128xbf16>
    %cst_10 = arith.constant dense<0.000000e+00> : vector<128x128xf32>
    %9 = tpu.matmul %1, %8, %cst_10 {dimension_numbers = #tpu.dot_dimension_numbers<[1], [0], [0], [1], [0, 0, 1, 1], [], []>} : vector<128x128xbf16>, vector<128x128xbf16>, vector<128x128xf32> -> vector<128x128xf32>
    %10 = arith.addf %6, %9 : vector<128x128xf32>
    %c0_11 = arith.constant 0 : index
    %c0_12 = arith.constant 0 : index
    %c0_13 = arith.constant 0 : index
    %11 = vector.load %arg4[%c0_11, %c0_12, %c0_13] : memref<2x1x128xf32, #tpu.memory_space<vmem>>, vector<1x1x128xf32>
    %12 = vector.shape_cast %11 : vector<1x1x128xf32> to vector<1x128xf32>
    %13 = vector.broadcast %12 : vector<1x128xf32> to vector<128x128xf32>
    %14 = arith.addf %10, %13 : vector<128x128xf32>
    %cst_14 = arith.constant 0.000000e+00 : f32
    %15 = vector.broadcast %cst_14 : f32 to vector<128x128xf32>
    %16 = arith.maximumf %14, %15 : vector<128x128xf32>
    %17 = arith.truncf %16 : vector<128x128xf32> to vector<128x128xbf16>
    %c0_15 = arith.constant 0 : index
    %c0_16 = arith.constant 0 : index
    %18 = vector.load %arg9[%c0_15, %c0_16] : memref<128x128xbf16, #tpu.memory_space<vmem>>, vector<128x128xbf16>
    tpu.vector_store %arg9[%c0_15, %c0_16], %17 {strides = array<i32>} : memref<128x128xbf16, #tpu.memory_space<vmem>>, vector<128x128xbf16>,
    %c0_17 = arith.constant 0 : index
    %c0_18 = arith.constant 0 : index
    %19 = vector.load %arg9[%c0_17, %c0_18] : memref<128x128xbf16, #tpu.memory_space<vmem>>, vector<128x128xbf16>
    %cst_19 = arith.constant dense<0.000000e+00> : vector<128x128xf32>
    %20 = tpu.matmul %0, %19, %cst_19 {dimension_numbers = #tpu.dot_dimension_numbers<[1], [0], [0], [1], [0, 0, 1, 1], [], []>} : vector<128x128xbf16>, vector<128x128xbf16>, vector<128x128xf32> -> vector<128x128xf32>
    %21 = arith.truncf %20 : vector<128x128xf32> to vector<128x128xbf16>
    %c1 = arith.constant 1 : index
    %c0_20 = arith.constant 0 : index
    %c0_21 = arith.constant 0 : index
    %22 = vector.load %arg2[%c1, %c0_20, %c0_21] : memref<2x128x128xbf16, #tpu.memory_space<vmem>>, vector<1x128x128xbf16>
    %23 = vector.shape_cast %22 : vector<1x128x128xbf16> to vector<128x128xbf16>
    %cst_22 = arith.constant dense<0.000000e+00> : vector<128x128xf32>
    %24 = tpu.matmul %21, %23, %cst_22 {dimension_numbers = #tpu.dot_dimension_numbers<[1], [0], [0], [1], [0, 0, 1, 1], [], []>} : vector<128x128xbf16>, vector<128x128xbf16>, vector<128x128xf32> -> vector<128x128xf32>
    %c1_23 = arith.constant 1 : index
    %c0_24 = arith.constant 0 : index
    %c0_25 = arith.constant 0 : index
    %25 = vector.load %arg3[%c1_23, %c0_24, %c0_25] : memref<2x128x128xbf16, #tpu.memory_space<vmem>>, vector<1x128x128xbf16>
    %26 = vector.shape_cast %25 : vector<1x128x128xbf16> to vector<128x128xbf16>
    %cst_26 = arith.constant dense<0.000000e+00> : vector<128x128xf32>
    %27 = tpu.matmul %19, %26, %cst_26 {dimension_numbers = #tpu.dot_dimension_numbers<[1], [0], [0], [1], [0, 0, 1, 1], [], []>} : vector<128x128xbf16>, vector<128x128xbf16>, vector<128x128xf32> -> vector<128x128xf32>
    %28 = arith.addf %24, %27 : vector<128x128xf32>
    %c1_27 = arith.constant 1 : index
    %c0_28 = arith.constant 0 : index
    %c0_29 = arith.constant 0 : index
    %29 = vector.load %arg4[%c1_27, %c0_28, %c0_29] : memref<2x1x128xf32, #tpu.memory_space<vmem>>, vector<1x1x128xf32>
    %30 = vector.shape_cast %29 : vector<1x1x128xf32> to vector<1x128xf32>
    %31 = vector.broadcast %30 : vector<1x128xf32> to vector<128x128xf32>
    %32 = arith.addf %28, %31 : vector<128x128xf32>
    %cst_30 = arith.constant 0.000000e+00 : f32
    %33 = vector.broadcast %cst_30 : f32 to vector<128x128xf32>
    %34 = arith.maximumf %32, %33 : vector<128x128xf32>
    %35 = arith.truncf %34 : vector<128x128xf32> to vector<128x128xbf16>
    %c0_31 = arith.constant 0 : index
    %c0_32 = arith.constant 0 : index
    %36 = vector.load %arg9[%c0_31, %c0_32] : memref<128x128xbf16, #tpu.memory_space<vmem>>, vector<128x128xbf16>
    tpu.vector_store %arg9[%c0_31, %c0_32], %35 {strides = array<i32>} : memref<128x128xbf16, #tpu.memory_space<vmem>>, vector<128x128xbf16>,
    %c0_33 = arith.constant 0 : index
    %c0_34 = arith.constant 0 : index
    %37 = vector.load %arg9[%c0_33, %c0_34] : memref<128x128xbf16, #tpu.memory_space<vmem>>, vector<128x128xbf16>
    %c0_35 = arith.constant 0 : index
    %c0_36 = arith.constant 0 : index
    %38 = vector.load %arg5[%c0_35, %c0_36] : memref<8x128xbf16, #tpu.memory_space<vmem>>, vector<8x128xbf16>
    %cst_37 = arith.constant dense<0.000000e+00> : vector<8x128xf32>
    %39 = tpu.matmul %38, %37, %cst_37 {dimension_numbers = #tpu.dot_dimension_numbers<[1], [0], [0], [1], [0, 0, 1, 1], [], []>} : vector<8x128xbf16>, vector<128x128xbf16>, vector<8x128xf32> -> vector<8x128xf32>
    %40 = arith.truncf %39 : vector<8x128xf32> to vector<8x128xbf16>
    %c0_38 = arith.constant 0 : index
    %c0_39 = arith.constant 0 : index
    %41 = vector.load %arg6[%c0_38, %c0_39] : memref<128x128xbf16, #tpu.memory_space<vmem>>, vector<128x128xbf16>
    %cst_40 = arith.constant dense<0.000000e+00> : vector<8x128xf32>
    %42 = tpu.matmul %40, %41, %cst_40 {dimension_numbers = #tpu.dot_dimension_numbers<[1], [0], [0], [1], [0, 0, 1, 1], [], []>} : vector<8x128xbf16>, vector<128x128xbf16>, vector<8x128xf32> -> vector<8x128xf32>
    %c0_41 = arith.constant 0 : index
    %c0_42 = arith.constant 0 : index
    %43 = vector.load %arg7[%c0_41, %c0_42] : memref<1x128xf32, #tpu.memory_space<vmem>>, vector<1x128xf32>
    %44 = vector.broadcast %43 : vector<1x128xf32> to vector<8x128xf32>
    %45 = arith.addf %42, %44 : vector<8x128xf32>
    %c0_43 = arith.constant 0 : index
    %c0_44 = arith.constant 0 : index
    %46 = vector.load %arg8[%c0_43, %c0_44] : memref<8x128xf32, #tpu.memory_space<vmem>>, vector<8x128xf32>
    tpu.vector_store %arg8[%c0_43, %c0_44], %45 {strides = array<i32>} : memref<8x128xf32, #tpu.memory_space<vmem>>, vector<8x128xf32>,
    return
  }
}

</mosaic_0001>

<bundles_post_ra>
// kernel: gnn_sage_fused.1
= control target key start
LH: loop header
LB: loop body
LE: loop exit
PB: predicated region body
PF: predicated region fallthrough
CT: control target
= control target key end

     0   :  { %13 = vsyncpa [#allocation4], 0  ;;  %s2077_s0 = inlined_call_operand.hbm [shape: bf16[128,128], index: 0, kind: input, shape index: {}]   ;;  %s2078_s1 = inlined_call_operand.hbm [shape: bf16[128,128], index: 1, kind: input, shape index: {}]   ;;  %s2079_s2 = inlined_call_operand.hbm [shape: bf16[2,128,128], index: 2, kind: input, shape index: {}]   ;;  %s2080_s3 = inlined_call_operand.hbm [shape: bf16[2,128,128], index: 3, kind: input, shape index: {}]   ;;  %s2081_s4 = inlined_call_operand.hbm [shape: f32[2,1,128], index: 4, kind: input, shape index: {}]   ;;  %s2082_s5 = inlined_call_operand.vmem [shape: bf16[8,128], index: 5, kind: input, shape index: {}]   ;;  %s2083_s6 = inlined_call_operand.hbm [shape: bf16[128,128], index: 6, kind: input, shape index: {}]   ;;  %s2084_s7 = inlined_call_operand.vmem [shape: f32[1,128], index: 7, kind: input, shape index: {}]   ;;  %s2085_s8 = inlined_call_operand.hbm [shape: f32[8,128], index: 8, kind: output, shape index: {}]  }
   0x1   :  { %14 = vsyncpa [#allocation7], 0 }
   0x2   :  { %15 = vsyncpa [#allocation10], 0 }
   0x3   :  { %16 = vsyncpa [#allocation13], 0 }
   0x4   :  { %17 = vsyncpa [#allocation5], 0  ;;  %s35_s29 = sshll.u32 %s2078_s1, 4  ;;  %s1864_s30 = smov [#allocation6]   ;;  %s36_s29 = int_to_ptr.hbm [resolvable:$true] %s35_s29 }
   0x5   :  { %s37_s9 = sshll.u32 %s1864_s30, 4  ;;  %s61_s12 = sshll.u32 %s2080_s3, 4  ;;  %s38_s9 = int_to_ptr.vmem [resolvable:$true] %s37_s9  ;;  %s62_s12 = int_to_ptr.hbm [resolvable:$true] %s61_s12 }
   0x6   :  { %s1865_s13 = smov 64   ;;  %s1866_s14 = smov 4  }
   0x7   :  { %43 = dma.hbm_to_vmem [thread:$0]  %s36_s29, 1024, %s38_s9, [#allocation7], %s1865_s13, %s1865_s13, %s1866_s14  }
   0x8   :  { %s1867_s15 = smov [#allocation9]   ;;  %s22_s1 = sshll.u32 %s2077_s0, 4  ;;  %s23_s1 = int_to_ptr.hbm [resolvable:$true] %s22_s1 }
   0x9   :  { %s63_s16 = sshll.u32 %s1867_s15, 4  ;;  %s48_s20 = sshll.u32 %s2079_s2, 4  ;;  %s64_s16 = int_to_ptr.vmem [resolvable:$true] %s63_s16  ;;  %s49_s20 = int_to_ptr.hbm [resolvable:$true] %s48_s20 }
   0xa   :  { %69 = dma.hbm_to_vmem [thread:$0]  %s62_s12, 2048, %s64_s16, [#allocation10], %s1865_s13, %s1865_s13, %s1866_s14  }
   0xb   :  { %s1868_s21 = smov [#allocation3]   ;;  %s1869_s23 = smov [#allocation8]  }
   0xc   :  { %s24_s22 = sshll.u32 %s1868_s21, 4  ;;  %s50_s0 = sshll.u32 %s1869_s23, 4  ;;  %s25_s22 = int_to_ptr.vmem [resolvable:$true] %s24_s22  ;;  %s51_s0 = int_to_ptr.vmem [resolvable:$true] %s50_s0 }
   0xd   :  { %30 = dma.hbm_to_vmem [thread:$0]  %s23_s1, 1024, %s25_s22, [#allocation4], %s1865_s13, %s1865_s13, %s1866_s14  }
   0xe   :  { %s74_s26 = sshll.u32 %s2081_s4, 4  ;;  %s1870_s2 = smov [#allocation11]   ;;  %s75_s26 = int_to_ptr.hbm [resolvable:$true] %s74_s26 }
   0xf   :  { %56 = dma.hbm_to_vmem [thread:$0]  %s49_s20, 2048, %s51_s0, [#allocation7], %s1865_s13, %s1865_s13, %s1866_s14  }
  0x10   :  { %s76_s27 = sshll.u32 %s1870_s2, 4  ;;  %s89_s30 = sshll.u32 %s2083_s6, 4  ;;  %s77_s27 = int_to_ptr.vmem [resolvable:$true] %s76_s27  ;;  %s90_s30 = int_to_ptr.hbm [resolvable:$true] %s89_s30 }
  0x11   :  { %s1871_s9 = smov 16   ;;  %s1872_s10 = smov 1  }
  0x12   :  { %82 = dma.hbm_to_vmem [thread:$0]  %s75_s26, 32, %s77_s27, [#allocation10], %s1871_s9, %s1871_s9, %s1872_s10  }
  0x13   :  { %s1873_s11 = smov [#allocation12]  }
  0x14   :  { %s91_s12 = sshll.u32 %s1873_s11, 4  ;;  %s92_s12 = int_to_ptr.vmem [resolvable:$true] %s91_s12 }
  0x15   :  { %97 = dma.hbm_to_vmem [thread:$0]  %s90_s30, 1024, %s92_s12, [#allocation13], %s1865_s13, %s1865_s13, %s1866_s14  }
  0x16   :  { %1854 = dma.done.wait [#allocation4], 1024  }
  0x17   :  { %1855 = vsyncadd [#allocation4], 4294966272 }
  0x18   :  { %1856 = dma.done.wait [#allocation7], 3072  }
  0x19   :  { %1857 = vsyncadd [#allocation7], 4294964224 }
  0x1a   :  { %1858 = dma.done.wait [#allocation10], 2080  }
  0x1b   :  { %1859 = vsyncadd [#allocation10], 4294965216 }
  0x1c   :  { %1860 = dma.done.wait [#allocation13], 1024  }
  0x1d   :  { %1861 = vsyncadd [#allocation13], 4294966272  ;;  %v1953_v0 = vld [vmem:[#allocation6 + $0x38] sm:$0xff]  ;;  %v1956_v1 = vld [vmem:[#allocation6 + $0x30] sm:$0xff]  ;;  %s1874_s15 = smov [#allocation14]   ;;  %s1189_s1 = sshll.u32 %s2085_s8, 4  ;;  %s1190_s1 = int_to_ptr.hbm [resolvable:$true] %s1189_s1 }
  0x1e   :  { %252 = vmatpush.bf16.msra.mxu0 %v1953_v0  ;;  %1656 = vmatpush.bf16.msra.mxu2 %v1953_v0  ;;  %v1960_v2 = vld [vmem:[#allocation6 + $0x28] sm:$0xff]  ;;  %v1964_v3 = vld [vmem:[#allocation6 + $0x20] sm:$0xff]  ;;  %v1968_v4 = vld [vmem:[#allocation6 + $0x18] sm:$0xff]  ;;  %s1187_s16 = sshll.u32 %s1874_s15, 4  ;;  %s1188_s16 = int_to_ptr.vmem [resolvable:$true] %s1187_s16 }
  0x1f   :  { %v1972_v5 = vld [vmem:[#allocation6 + $0x10] sm:$0xff]  ;;  %v1976_v6 = vld [vmem:[#allocation6 + $0x8] sm:$0xff]  ;;  %v1498_v7 = vld [vmem:[#allocation6] sm:$0xff] }
  0x20   :  { %v1981_v8 = vld [vmem:[#allocation3] sm:$0xff]  ;;  %v1984_v9 = vld [vmem:[#allocation3 + $0x8] sm:$0xff]  ;;  %v1987_v10 = vld [vmem:[#allocation3 + $0x10] sm:$0xff] }
  0x21   :  { %v1990_v11 = vld [vmem:[#allocation3 + $0x28] sm:$0xff]  ;;  %v1513_v12 = vld [vmem:[#allocation8 + $0x38] sm:$0xff]  ;;  %v1512_v14 = vld [vmem:[#allocation8 + $0x30] sm:$0xff] }
  0x22   :  { %253 = vmatpush.bf16.msra.mxu0 %v1956_v1  ;;  %1657 = vmatpush.bf16.msra.mxu2 %v1956_v1  ;;  %v1521_v13 = vld [vmem:[#allocation9 + $0x38] sm:$0xff]  ;;  %v1520_v15 = vld [vmem:[#allocation9 + $0x30] sm:$0xff]  ;;  %v1511_v16 = vld [vmem:[#allocation8 + $0x28] sm:$0xff] }
  0x23   :  { %389 = vmatpush.bf16.msra.mxu1 %v1521_v13  ;;  %1664 = vmatpush.bf16.msra.mxu3 %v1521_v13  ;;  %v1519_v17 = vld [vmem:[#allocation9 + $0x28] sm:$0xff]  ;;  %v1993_v18 = vld [vmem:[#allocation3 + $0x18] sm:$0xff]  ;;  %v1510_v19 = vld [vmem:[#allocation8 + $0x20] sm:$0xff] }
  0x24   :  { %v1518_v20 = vld [vmem:[#allocation9 + $0x20] sm:$0xff]  ;;  %v1995_v21 = vld [vmem:[#allocation3 + $0x30] sm:$0xff]  ;;  %v1509_v22 = vld [vmem:[#allocation8 + $0x18] sm:$0xff] }
  0x25   :  { %v1999_v23 = vld [vmem:[#allocation3 + $0x20] sm:$0xff]  ;;  %v2001_v24 = vld [vmem:[#allocation3 + $0x38] sm:$0xff]  ;;  %v1508_v25 = vld [vmem:[#allocation8 + $0x10] sm:$0xff] }
  0x26   :  { %254 = vmatpush.bf16.msra.mxu0 %v1960_v2  ;;  %1658 = vmatpush.bf16.msra.mxu2 %v1960_v2  ;;  %v1517_v26 = vld [vmem:[#allocation9 + $0x18] sm:$0xff]  ;;  %v1507_v27 = vld [vmem:[#allocation8 + $0x8] sm:$0xff]  ;;  %v1516_v28 = vld [vmem:[#allocation9 + $0x10] sm:$0xff] }
  0x27   :  { %390 = vmatpush.bf16.msra.mxu1 %v1520_v15  ;;  %1665 = vmatpush.bf16.msra.mxu3 %v1520_v15  ;;  %v1506_v29 = vld [vmem:[#allocation8] sm:$0xff]  ;;  %v1515_v30 = vld [vmem:[#allocation9 + $0x8] sm:$0xff]  ;;  %v1545_v51 = vld [vmem:[#allocation9 + $0x78] sm:$0xff] }
  0x28   :  { %v1514_v31 = vld [vmem:[#allocation9] sm:$0xff]  ;;  %v1544_v54 = vld [vmem:[#allocation9 + $0x70] sm:$0xff]  ;;  %v1543_v56 = vld [vmem:[#allocation9 + $0x68] sm:$0xff] }
  0x29   :  { %v1542_v57 = vld [vmem:[#allocation9 + $0x60] sm:$0xff]  ;;  %v1541_v59 = vld [vmem:[#allocation9 + $0x58] sm:$0xff]  ;;  %v1540_v62 = vld [vmem:[#allocation9 + $0x50] sm:$0xff] }
  0x2a   :  { %255 = vmatpush.bf16.msra.mxu0 %v1964_v3  ;;  %1659 = vmatpush.bf16.msra.mxu2 %v1964_v3  ;;  %v1539_v63 = vld [vmem:[#allocation9 + $0x48] sm:$0xff] }
  0x2b   :  { %391 = vmatpush.bf16.msra.mxu1 %v1519_v17  ;;  %1666 = vmatpush.bf16.msra.mxu3 %v1519_v17 }
  0x2e   :  { %256 = vmatpush.bf16.msra.mxu0 %v1968_v4  ;;  %1660 = vmatpush.bf16.msra.mxu2 %v1968_v4 }
  0x2f   :  { %392 = vmatpush.bf16.msra.mxu1 %v1518_v20  ;;  %1667 = vmatpush.bf16.msra.mxu3 %v1518_v20 }
  0x32   :  { %257 = vmatpush.bf16.msra.mxu0 %v1972_v5  ;;  %1661 = vmatpush.bf16.msra.mxu2 %v1972_v5 }
  0x33   :  { %393 = vmatpush.bf16.msra.mxu1 %v1517_v26  ;;  %1668 = vmatpush.bf16.msra.mxu3 %v1517_v26 }
  0x36   :  { %258 = vmatpush.bf16.msra.mxu0 %v1976_v6  ;;  %1662 = vmatpush.bf16.msra.mxu2 %v1976_v6 }
  0x37   :  { %394 = vmatpush.bf16.msra.mxu1 %v1516_v28  ;;  %1669 = vmatpush.bf16.msra.mxu3 %v1516_v28 }
  0x3a   :  { %259 = vmatpush.bf16.msra.mxu0 %v1498_v7  ;;  %1663 = vmatpush.bf16.msra.mxu2 %v1498_v7 }
  0x3b   :  { %395 = vmatpush.bf16.msra.mxu1 %v1515_v30  ;;  %1670 = vmatpush.bf16.msra.mxu3 %v1515_v30 }
  0x3d   :  { %260 = vmatmul.bf16.vlgmr.msra.gmra.mxu0 %v1981_v8  ;;  %285 = vmatmul.bf16.vlgmr.msra.gmra.mxu2 %v1990_v11 }
  0x3e   :  { %486 = vmatpush.bf16.msrb.mxu2 %v1513_v12  ;;  %806 = vmatpush.bf16.msrb.mxu0 %v1545_v51 }
  0x3f   :  { %396 = vmatpush.bf16.msra.mxu1 %v1514_v31  ;;  %1671 = vmatpush.bf16.msra.mxu3 %v1514_v31 }
  0x42   :  { %487 = vmatpush.bf16.msrb.mxu2 %v1512_v14  ;;  %397 = vmatmul.bf16.vlgmr.msra.gmra.mxu1 %v1498_v7 }
  0x43   :  { %422 = vmatmul.bf16.vlgmr.msra.gmra.mxu3 %v1960_v2  ;;  %807 = vmatpush.bf16.msrb.mxu0 %v1544_v54 }
  0x46   :  { %488 = vmatpush.bf16.msrb.mxu2 %v1511_v16 }
  0x47   :  { %808 = vmatpush.bf16.msrb.mxu0 %v1543_v56 }
  0x4a   :  { %489 = vmatpush.bf16.msrb.mxu2 %v1510_v19 }
  0x4b   :  { %809 = vmatpush.bf16.msrb.mxu0 %v1542_v57 }
  0x4d   :  { %265 = vmatmul.bf16.gmra.mxu0 %v1984_v9  ;;  %290 = vmatmul.bf16.gmra.mxu2 %v1995_v21 }
  0x4e   :  { %490 = vmatpush.bf16.msrb.mxu2 %v1509_v22 }
  0x4f   :  { %810 = vmatpush.bf16.msrb.mxu0 %v1541_v59 }
  0x52   :  { %491 = vmatpush.bf16.msrb.mxu2 %v1508_v25  ;;  %402 = vmatmul.bf16.gmra.mxu1 %v1976_v6 }
  0x53   :  { %427 = vmatmul.bf16.gmra.mxu3 %v1956_v1  ;;  %811 = vmatpush.bf16.msrb.mxu0 %v1540_v62 }
  0x56   :  { %492 = vmatpush.bf16.msrb.mxu2 %v1507_v27 }
  0x57   :  { %812 = vmatpush.bf16.msrb.mxu0 %v1539_v63 }
  0x5a   :  { %493 = vmatpush.bf16.msrb.mxu2 %v1506_v29 }
  0x5d   :  { %270 = vmatmul.bf16.gmra.mxu0 %v1987_v10  ;;  %295 = vmatmul.bf16.gmra.mxu2 %v2001_v24 }
  0x62   :  { %407 = vmatmul.bf16.gmra.mxu1 %v1972_v5  ;;  %v2012_v5 = vld [vmem:[#allocation11] ss:$0 sm:$0xff] }
  0x63   :  { %432 = vmatmul.bf16.gmra.mxu3 %v1953_v0  ;;  %v1538_v0 = vld [vmem:[#allocation9 + $0x40] sm:$0xff] }
  0x64   :  { %813 = vmatpush.bf16.msrb.mxu0 %v1538_v0 }
  0x6d   :  { %275 = vmatmul.bf16.gmra.mxu0 %v1993_v18 }
  0x72   :  { %412 = vmatmul.bf16.gmra.mxu1 %v1968_v4 }
  0x7d   :  { %280 = vmatmul.bf16.gmra.mxu0 %v1999_v23 }
  0x82   :  { %417 = vmatmul.bf16.gmra.mxu1 %v1964_v3 }
  0xba   :  { %v261_v32 = vpop.f32.mrf.mxu0 }
  0xbf   :  { %v398_v61 = vpop.f32.mrf.mxu1 }
  0xc0   :  { %v286_v45 = vpop.f32.mrf.mxu2 }
  0xc2   :  { %v263_v33 = vpop.f32.mrf.mxu0 }
  0xc3   :  { %v301_v34 = vpack.c.bf16 %v263_v33, %v261_v32 }
  0xc5   :  { %494 = vmatmul.bf16.vlgmr.msrb.gmra.mxu2 %v301_v34 }
  0xc7   :  { %v400_v1 = vpop.f32.mrf.mxu1 }
  0xc8   :  { %v288_v48 = vpop.f32.mrf.mxu2 }
  0xc9   :  { %v306_v50 = vpack.c.bf16 %v288_v48, %v286_v45 }
  0xca   :  { %v266_v35 = vpop.f32.mrf.mxu0 }
  0xcf   :  { %v403_v3 = vpop.f32.mrf.mxu1 }
  0xd0   :  { %v291_v49 = vpop.f32.mrf.mxu2 }
  0xd2   :  { %v268_v36 = vpop.f32.mrf.mxu0 }
  0xd3   :  { %v302_v37 = vpack.c.bf16 %v268_v36, %v266_v35 }
  0xd5   :  { %499 = vmatmul.bf16.gmra.mxu2 %v302_v37 }
  0xd7   :  { %v405_v13 = vpop.f32.mrf.mxu1 }
  0xd8   :  { %v293_v52 = vpop.f32.mrf.mxu2 }
  0xd9   :  { %v307_v53 = vpack.c.bf16 %v293_v52, %v291_v49 }
  0xda   :  { %v271_v38 = vpop.f32.mrf.mxu0 }
  0xdf   :  { %v408_v20 = vpop.f32.mrf.mxu1 }
  0xe0   :  { %v296_v55 = vpop.f32.mrf.mxu2 }
  0xe2   :  { %v273_v39 = vpop.f32.mrf.mxu0 }
  0xe3   :  { %v303_v40 = vpack.c.bf16 %v273_v39, %v271_v38 }
  0xe5   :  { %504 = vmatmul.bf16.gmra.mxu2 %v303_v40 }
  0xe7   :  { %v410_v32 = vpop.f32.mrf.mxu1 }
  0xe8   :  { %v298_v58 = vpop.f32.mrf.mxu2 }
  0xe9   :  { %v308_v60 = vpack.c.bf16 %v298_v58, %v296_v55 }
  0xea   :  { %v276_v41 = vpop.f32.mrf.mxu0 }
  0xef   :  { %v413_v38 = vpop.f32.mrf.mxu1 }
  0xf2   :  { %v278_v42 = vpop.f32.mrf.mxu0 }
  0xf3   :  { %v304_v43 = vpack.c.bf16 %v278_v42, %v276_v41 }
  0xf5   :  { %509 = vmatmul.bf16.gmra.mxu2 %v304_v43 }
  0xfa   :  { %v281_v44 = vpop.f32.mrf.mxu0 }
 0x102   :  { %v283_v46 = vpop.f32.mrf.mxu0 }
 0x103   :  { %v305_v47 = vpack.c.bf16 %v283_v46, %v281_v44  ;;  %v415_v46 = vpop.f32.mrf.mxu1 }
 0x105   :  { %514 = vmatmul.bf16.gmra.mxu2 %v305_v47 }
 0x115   :  { %519 = vmatmul.bf16.gmra.mxu2 %v306_v50 }
 0x125   :  { %524 = vmatmul.bf16.gmra.mxu2 %v307_v53  ;;  %v418_v53 = vpop.f32.mrf.mxu1 }
 0x12d   :  { %v420_v59 = vpop.f32.mrf.mxu1 }
 0x135   :  { %529 = vmatmul.bf16.gmra.mxu2 %v308_v60  ;;  %v423_v60 = vpop.f32.mrf.mxu3 }
 0x148   :  { %v495_v2 = vpop.f32.mrf.mxu2 }
 0x149   :  { %v496_v4 = vadd.f32 %v495_v2, %v398_v61 }
 0x14b   :  { %v539_v7 = vadd.f32 %v2012_v5, %v496_v4 }
 0x14d   :  { %v555_v15 = vmax.f32 %v539_v7, 0.0 }
 0x150   :  { %v497_v6 = vpop.f32.mrf.mxu2 }
 0x151   :  { %v498_v12 = vadd.f32 %v497_v6, %v400_v1  ;;  %v425_v6 = vpop.f32.mrf.mxu3 }
 0x153   :  { %v540_v14 = vadd.f32 %v2012_v5, %v498_v12 }
 0x155   :  { %v556_v16 = vmax.f32 %v540_v14, 0.0 }
 0x157   :  { %v1565_v17 = vpack.c.bf16 %v556_v16, %v555_v15 }
 0x158   :  { %v500_v19 = vpop.f32.mrf.mxu2 }
 0x159   :  { %1566 = vst [vmem:[#allocation2 + $0x30] sm:$0xff] %v1565_v17   ;;  %v501_v22 = vadd.f32 %v500_v19, %v403_v3  ;;  %v428_v17 = vpop.f32.mrf.mxu3 }
 0x15b   :  { %v541_v27 = vadd.f32 %v2012_v5, %v501_v22 }
 0x15d   :  { %v557_v30 = vmax.f32 %v541_v27, 0.0 }
 0x160   :  { %v502_v25 = vpop.f32.mrf.mxu2  ;;  %v2016_v26 = vld [vmem:[#allocation2 + $0x30] sm:$0xff] }
 0x161   :  { %v503_v28 = vadd.f32 %v502_v25, %v405_v13  ;;  %814 = vmatmul.bf16.vlgmr.msrb.gmra.mxu0 %v2016_v26 }
 0x163   :  { %v542_v29 = vadd.f32 %v2012_v5, %v503_v28  ;;  %v430_v28 = vpop.f32.mrf.mxu3 }
 0x165   :  { %v558_v31 = vmax.f32 %v542_v29, 0.0 }
 0x167   :  { %v1570_v33 = vpack.c.bf16 %v558_v31, %v557_v30 }
 0x168   :  { %v505_v34 = vpop.f32.mrf.mxu2 }
 0x169   :  { %1642 = vst [vmem:[#allocation2] sm:$0xff] %v1570_v33   ;;  %v506_v35 = vadd.f32 %v505_v34, %v408_v20 }
 0x16b   :  { %v543_v39 = vadd.f32 %v2012_v5, %v506_v35 }
 0x16d   :  { %v559_v42 = vmax.f32 %v543_v39, 0.0 }
 0x170   :  { %v507_v36 = vpop.f32.mrf.mxu2  ;;  %v2021_v37 = vld [vmem:[#allocation2] sm:$0xff] }
 0x171   :  { %v508_v40 = vadd.f32 %v507_v36, %v410_v32  ;;  %819 = vmatmul.bf16.gmra.mxu0 %v2021_v37 }
 0x173   :  { %v544_v41 = vadd.f32 %v2012_v5, %v508_v40 }
 0x175   :  { %v560_v43 = vmax.f32 %v544_v41, 0.0 }
 0x177   :  { %v1575_v44 = vpack.c.bf16 %v560_v43, %v559_v42 }
 0x178   :  { %v510_v45 = vpop.f32.mrf.mxu2 }
 0x179   :  { %1643 = vst [vmem:[#allocation2 + $0x18] sm:$0xff] %v1575_v44   ;;  %v511_v47 = vadd.f32 %v510_v45, %v413_v38  ;;  %v433_v38 = vpop.f32.mrf.mxu3 }
 0x17b   :  { %v545_v50 = vadd.f32 %v2012_v5, %v511_v47 }
 0x17d   :  { %v561_v54 = vmax.f32 %v545_v50, 0.0 }
 0x180   :  { %v512_v48 = vpop.f32.mrf.mxu2  ;;  %v2026_v49 = vld [vmem:[#allocation2 + $0x18] sm:$0xff] }
 0x181   :  { %v513_v51 = vadd.f32 %v512_v48, %v415_v46  ;;  %824 = vmatmul.bf16.gmra.mxu0 %v2026_v49  ;;  %v435_v42 = vpop.f32.mrf.mxu3 }
 0x183   :  { %v546_v52 = vadd.f32 %v2012_v5, %v513_v51 }
 0x185   :  { %v562_v55 = vmax.f32 %v546_v52, 0.0 }
 0x187   :  { %v1580_v56 = vpack.c.bf16 %v562_v55, %v561_v54 }
 0x188   :  { %v515_v57 = vpop.f32.mrf.mxu2 }
 0x189   :  { %1644 = vst [vmem:[#allocation2 + $0x10] sm:$0xff] %v1580_v56   ;;  %v516_v58 = vadd.f32 %v515_v57, %v418_v53  ;;  %v1536_v53 = vld [vmem:[#allocation8 + $0x70] sm:$0xff] }
 0x18b   :  { %v547_v63 = vadd.f32 %v2012_v5, %v516_v58 }
 0x18d   :  { %v563_v2 = vmax.f32 %v547_v63, 0.0 }
 0x190   :  { %v517_v61 = vpop.f32.mrf.mxu2  ;;  %v1525_v62 = vld [vmem:[#allocation2 + $0x10] sm:$0xff] }
 0x191   :  { %v518_v0 = vadd.f32 %v517_v61, %v420_v59  ;;  %829 = vmatmul.bf16.gmra.mxu0 %v1525_v62 }
 0x193   :  { %v548_v1 = vadd.f32 %v2012_v5, %v518_v0 }
 0x195   :  { %v564_v3 = vmax.f32 %v548_v1, 0.0 }
 0x197   :  { %v1585_v4 = vpack.c.bf16 %v564_v3, %v563_v2 }
 0x198   :  { %v520_v7 = vpop.f32.mrf.mxu2 }
 0x199   :  { %1645 = vst [vmem:[#allocation2 + $0x8] sm:$0xff] %v1585_v4   ;;  %v521_v12 = vadd.f32 %v520_v7, %v423_v60 }
 0x19b   :  { %v549_v15 = vadd.f32 %v2012_v5, %v521_v12 }
 0x19d   :  { %v565_v20 = vmax.f32 %v549_v15, 0.0 }
 0x1a0   :  { %v522_v13 = vpop.f32.mrf.mxu2  ;;  %v1526_v14 = vld [vmem:[#allocation2 + $0x8] sm:$0xff] }
 0x1a1   :  { %v523_v16 = vadd.f32 %v522_v13, %v425_v6  ;;  %834 = vmatmul.bf16.gmra.mxu0 %v1526_v14 }
 0x1a3   :  { %v550_v19 = vadd.f32 %v2012_v5, %v523_v16 }
 0x1a5   :  { %v566_v22 = vmax.f32 %v550_v19, 0.0 }
 0x1a7   :  { %v1590_v25 = vpack.c.bf16 %v566_v22, %v565_v20  ;;  %v2050_v22 = vld [vmem:[#allocation11 + $0x1] ss:$0 sm:$0xff] }
 0x1a8   :  { %v525_v27 = vpop.f32.mrf.mxu2 }
 0x1a9   :  { %1646 = vst [vmem:[#allocation2 + $0x20] sm:$0xff] %v1590_v25   ;;  %v526_v29 = vadd.f32 %v525_v27, %v428_v17 }
 0x1ab   :  { %v551_v32 = vadd.f32 %v2012_v5, %v526_v29 }
 0x1ad   :  { %v567_v35 = vmax.f32 %v551_v32, 0.0 }
 0x1b0   :  { %v527_v30 = vpop.f32.mrf.mxu2  ;;  %v1527_v31 = vld [vmem:[#allocation2 + $0x20] sm:$0xff] }
 0x1b1   :  { %v528_v33 = vadd.f32 %v527_v30, %v430_v28  ;;  %839 = vmatmul.bf16.gmra.mxu0 %v1527_v31 }
 0x1b3   :  { %v552_v34 = vadd.f32 %v2012_v5, %v528_v33 }
 0x1b5   :  { %v568_v36 = vmax.f32 %v552_v34, 0.0 }
 0x1b7   :  { %v1595_v39 = vpack.c.bf16 %v568_v36, %v567_v35 }
 0x1b8   :  { %v530_v40 = vpop.f32.mrf.mxu2 }
 0x1b9   :  { %1647 = vst [vmem:[#allocation2 + $0x28] sm:$0xff] %v1595_v39   ;;  %v531_v41 = vadd.f32 %v530_v40, %v433_v38 }
 0x1bb   :  { %v553_v45 = vadd.f32 %v2012_v5, %v531_v41 }
 0x1bd   :  { %v569_v48 = vmax.f32 %v553_v45, 0.0 }
 0x1c0   :  { %v532_v43 = vpop.f32.mrf.mxu2  ;;  %v1528_v44 = vld [vmem:[#allocation2 + $0x28] sm:$0xff] }
 0x1c1   :  { %v533_v46 = vadd.f32 %v532_v43, %v435_v42  ;;  %844 = vmatmul.bf16.gmra.mxu0 %v1528_v44 }
 0x1c3   :  { %v554_v47 = vadd.f32 %v2012_v5, %v533_v46  ;;  %v1537_v5 = vld [vmem:[#allocation8 + $0x78] sm:$0xff] }
 0x1c4   :  { %903 = vmatpush.bf16.msrb.mxu1 %v1537_v5 }
 0x1c5   :  { %v570_v50 = vmax.f32 %v554_v47, 0.0 }
 0x1c7   :  { %v1600_v51 = vpack.c.bf16 %v570_v50, %v569_v48 }
 0x1c8   :  { %904 = vmatpush.bf16.msrb.mxu1 %v1536_v53 }
 0x1c9   :  { %1648 = vst [vmem:[#allocation2 + $0x38] sm:$0xff] %v1600_v51  }
 0x1d0   :  { %v1529_v52 = vld [vmem:[#allocation2 + $0x38] sm:$0xff] }
 0x1d1   :  { %667 = vmatpush.bf16.msrb.mxu3 %v1529_v52  ;;  %849 = vmatmul.bf16.gmra.mxu0 %v1529_v52 }
 0x1d5   :  { %668 = vmatpush.bf16.msrb.mxu3 %v1528_v44 }
 0x1d9   :  { %669 = vmatpush.bf16.msrb.mxu3 %v1527_v31 }
 0x1dd   :  { %670 = vmatpush.bf16.msrb.mxu3 %v1526_v14 }
 0x1de   :  { %v815_v7 = vpop.f32.mrf.mxu0 }
 0x1e1   :  { %671 = vmatpush.bf16.msrb.mxu3 %v1525_v62 }
 0x1e5   :  { %672 = vmatpush.bf16.msrb.mxu3 %v2026_v49  ;;  %v1535_v49 = vld [vmem:[#allocation8 + $0x68] sm:$0xff] }
 0x1e6   :  { %905 = vmatpush.bf16.msrb.mxu1 %v1535_v49  ;;  %v817_v13 = vpop.f32.mrf.mxu0 }
 0x1e9   :  { %673 = vmatpush.bf16.msrb.mxu3 %v2021_v37  ;;  %v1534_v37 = vld [vmem:[#allocation8 + $0x60] sm:$0xff] }
 0x1ea   :  { %906 = vmatpush.bf16.msrb.mxu1 %v1534_v37 }
 0x1ed   :  { %674 = vmatpush.bf16.msrb.mxu3 %v2016_v26  ;;  %v1533_v26 = vld [vmem:[#allocation8 + $0x58] sm:$0xff] }
 0x1ee   :  { %907 = vmatpush.bf16.msrb.mxu1 %v1533_v26  ;;  %v820_v16 = vpop.f32.mrf.mxu0 }
 0x1f0   :  { %675 = vmatmul.bf16.vlgmr.msrb.gmra.mxu3 %v1981_v8  ;;  %v1532_v8 = vld [vmem:[#allocation8 + $0x50] sm:$0xff] }
 0x1f2   :  { %908 = vmatpush.bf16.msrb.mxu1 %v1532_v8 }
 0x1f6   :  { %v822_v17 = vpop.f32.mrf.mxu0 }
 0x1fe   :  { %v825_v29 = vpop.f32.mrf.mxu0 }
 0x200   :  { %680 = vmatmul.bf16.gmra.mxu3 %v1984_v9  ;;  %v1531_v9 = vld [vmem:[#allocation8 + $0x48] sm:$0xff] }
 0x201   :  { %909 = vmatpush.bf16.msrb.mxu1 %v1531_v9 }
 0x206   :  { %v827_v35 = vpop.f32.mrf.mxu0 }
 0x20e   :  { %v830_v44 = vpop.f32.mrf.mxu0 }
 0x210   :  { %685 = vmatmul.bf16.gmra.mxu3 %v1987_v10  ;;  %v1530_v10 = vld [vmem:[#allocation8 + $0x40] sm:$0xff] }
 0x211   :  { %910 = vmatpush.bf16.msrb.mxu1 %v1530_v10 }
 0x216   :  { %v832_v48 = vpop.f32.mrf.mxu0 }
 0x21e   :  { %v835_v8 = vpop.f32.mrf.mxu0 }
 0x220   :  { %690 = vmatmul.bf16.gmra.mxu3 %v1993_v18 }
 0x230   :  { %695 = vmatmul.bf16.gmra.mxu3 %v1999_v23 }
 0x240   :  { %700 = vmatmul.bf16.gmra.mxu3 %v1990_v11 }
 0x250   :  { %705 = vmatmul.bf16.gmra.mxu3 %v1995_v21 }
 0x260   :  { %710 = vmatmul.bf16.gmra.mxu3 %v2001_v24 }
 0x273   :  { %v676_v18 = vpop.f32.mrf.mxu3 }
 0x27b   :  { %v678_v11 = vpop.f32.mrf.mxu3 }
 0x27c   :  { %v716_v23 = vpack.c.bf16 %v678_v11, %v676_v18 }
 0x27e   :  { %911 = vmatmul.bf16.vlgmr.msrb.gmra.mxu1 %v716_v23 }
 0x283   :  { %v681_v54 = vpop.f32.mrf.mxu3 }
 0x28b   :  { %v683_v55 = vpop.f32.mrf.mxu3 }
 0x28c   :  { %v717_v56 = vpack.c.bf16 %v683_v55, %v681_v54  ;;  %v837_v54 = vpop.f32.mrf.mxu0 }
 0x28e   :  { %916 = vmatmul.bf16.gmra.mxu1 %v717_v56 }
 0x293   :  { %v686_v57 = vpop.f32.mrf.mxu3 }
 0x29b   :  { %v688_v58 = vpop.f32.mrf.mxu3 }
 0x29c   :  { %v718_v59 = vpack.c.bf16 %v688_v58, %v686_v57 }
 0x29e   :  { %921 = vmatmul.bf16.gmra.mxu1 %v718_v59 }
 0x2a3   :  { %v691_v21 = vpop.f32.mrf.mxu3 }
 0x2ab   :  { %v693_v60 = vpop.f32.mrf.mxu3 }
 0x2ac   :  { %v719_v61 = vpack.c.bf16 %v693_v60, %v691_v21  ;;  %v840_v21 = vpop.f32.mrf.mxu0 }
 0x2ae   :  { %926 = vmatmul.bf16.gmra.mxu1 %v719_v61 }
 0x2b3   :  { %v696_v62 = vpop.f32.mrf.mxu3 }
 0x2bb   :  { %v698_v63 = vpop.f32.mrf.mxu3 }
 0x2bc   :  { %v720_v0 = vpack.c.bf16 %v698_v63, %v696_v62 }
 0x2be   :  { %931 = vmatmul.bf16.gmra.mxu1 %v720_v0 }
 0x2c3   :  { %v701_v24 = vpop.f32.mrf.mxu3 }
 0x2cb   :  { %v703_v1 = vpop.f32.mrf.mxu3 }
 0x2cc   :  { %v721_v2 = vpack.c.bf16 %v703_v1, %v701_v24 }
 0x2ce   :  { %936 = vmatmul.bf16.gmra.mxu1 %v721_v2  ;;  %v842_v2 = vpop.f32.mrf.mxu0 }
 0x2d3   :  { %v706_v3 = vpop.f32.mrf.mxu3 }
 0x2db   :  { %v708_v4 = vpop.f32.mrf.mxu3 }
 0x2dc   :  { %v722_v6 = vpack.c.bf16 %v708_v4, %v706_v3 }
 0x2de   :  { %941 = vmatmul.bf16.gmra.mxu1 %v722_v6 }
 0x2e3   :  { %v711_v12 = vpop.f32.mrf.mxu3 }
 0x2eb   :  { %v713_v14 = vpop.f32.mrf.mxu3 }
 0x2ec   :  { %v723_v15 = vpack.c.bf16 %v713_v14, %v711_v12 }
 0x2ee   :  { %946 = vmatmul.bf16.gmra.mxu1 %v723_v15 }
 0x2fb   :  { %v912_v19 = vpop.f32.mrf.mxu1 }
 0x2fc   :  { %v913_v20 = vadd.f32 %v912_v19, %v815_v7 }
 0x2fe   :  { %v957_v27 = vadd.f32 %v2050_v22, %v913_v20 }
 0x300   :  { %v973_v31 = vmax.f32 %v957_v27, 0.0 }
 0x303   :  { %v914_v25 = vpop.f32.mrf.mxu1 }
 0x304   :  { %v915_v28 = vadd.f32 %v914_v25, %v817_v13  ;;  %v845_v13 = vpop.f32.mrf.mxu0 }
 0x306   :  { %v958_v30 = vadd.f32 %v2050_v22, %v915_v28 }
 0x308   :  { %v974_v32 = vmax.f32 %v958_v30, 0.0 }
 0x30a   :  { %v1605_v33 = vpack.c.bf16 %v974_v32, %v973_v31 }
 0x30b   :  { %v917_v34 = vpop.f32.mrf.mxu1 }
 0x30c   :  { %1606 = vst [vmem:[#allocation2 + $0x30] sm:$0xff] %v1605_v33   ;;  %v918_v36 = vadd.f32 %v917_v34, %v820_v16  ;;  %v847_v20 = vpop.f32.mrf.mxu0 }
 0x30e   :  { %v959_v39 = vadd.f32 %v2050_v22, %v918_v36 }
 0x310   :  { %v975_v42 = vmax.f32 %v959_v39, 0.0 }
 0x313   :  { %v919_v38 = vpop.f32.mrf.mxu1 }
 0x314   :  { %v920_v40 = vadd.f32 %v919_v38, %v822_v17  ;;  %v850_v33 = vpop.f32.mrf.mxu0 }
 0x316   :  { %v960_v41 = vadd.f32 %v2050_v22, %v920_v40 }
 0x318   :  { %v976_v43 = vmax.f32 %v960_v41, 0.0 }
 0x31a   :  { %v1610_v45 = vpack.c.bf16 %v976_v43, %v975_v42 }
 0x31b   :  { %v922_v46 = vpop.f32.mrf.mxu1 }
 0x31c   :  { %1649 = vst [vmem:[#allocation2] sm:$0xff] %v1610_v45   ;;  %v923_v47 = vadd.f32 %v922_v46, %v825_v29  ;;  %v852_v38 = vpop.f32.mrf.mxu0 }
 0x31e   :  { %v961_v51 = vadd.f32 %v2050_v22, %v923_v47  ;;  %v1561_v47 = vld [vmem:[#allocation12 + $0x38] sm:$0xff] }
 0x31f   :  { %1168 = vmatpush.bf16.msra.mxu3 %v1561_v47 }
 0x320   :  { %v977_v53 = vmax.f32 %v961_v51, 0.0  ;;  %v1559_v51 = vld [vmem:[#allocation12 + $0x28] sm:$0xff] }
 0x323   :  { %v924_v50 = vpop.f32.mrf.mxu1 }
 0x324   :  { %v925_v52 = vadd.f32 %v924_v50, %v827_v35 }
 0x326   :  { %v962_v5 = vadd.f32 %v2050_v22, %v925_v52 }
 0x328   :  { %v978_v49 = vmax.f32 %v962_v5, 0.0  ;;  %v1558_v5 = vld [vmem:[#allocation12 + $0x20] sm:$0xff] }
 0x32a   :  { %v1615_v37 = vpack.c.bf16 %v978_v49, %v977_v53 }
 0x32b   :  { %v927_v26 = vpop.f32.mrf.mxu1 }
 0x32c   :  { %1650 = vst [vmem:[#allocation2 + $0x18] sm:$0xff] %v1615_v37   ;;  %v928_v9 = vadd.f32 %v927_v26, %v830_v44  ;;  %v1556_v37 = vld [vmem:[#allocation12 + $0x10] sm:$0xff] }
 0x32e   :  { %v963_v18 = vadd.f32 %v2050_v22, %v928_v9  ;;  %v1547_v9 = vld [vmem:[#allocation2] sm:$0xff] }
 0x330   :  { %v979_v55 = vmax.f32 %v963_v18, 0.0  ;;  %v1546_v18 = vld [vmem:[#allocation2 + $0x30] sm:$0xff] }
 0x333   :  { %v929_v10 = vpop.f32.mrf.mxu1  ;;  %v1548_v26 = vld [vmem:[#allocation2 + $0x18] sm:$0xff] }
 0x334   :  { %v930_v11 = vadd.f32 %v929_v10, %v832_v48  ;;  %v1560_v48 = vld [vmem:[#allocation12 + $0x30] sm:$0xff]  ;;  %v1554_v10 = vld [vmem:[#allocation12] sm:$0xff] }
 0x335   :  { %1169 = vmatpush.bf16.msra.mxu3 %v1560_v48 }
 0x336   :  { %v964_v23 = vadd.f32 %v2050_v22, %v930_v11  ;;  %v1037_v11 = vld [vmem:[%s2082_s5] sm:$0xf] }
 0x338   :  { %v980_v56 = vmax.f32 %v964_v23, 0.0 }
 0x339   :  { %1170 = vmatpush.bf16.msra.mxu3 %v1559_v51 }
 0x33a   :  { %v1620_v57 = vpack.c.bf16 %v980_v56, %v979_v55  ;;  %v1685_v56 = vld [vmem:[%s2084_s7] ss:$0 sm:$0xff] }
 0x33b   :  { %v932_v58 = vpop.f32.mrf.mxu1 }
 0x33c   :  { %1651 = vst [vmem:[#allocation2 + $0x10] sm:$0xff] %v1620_v57   ;;  %v933_v59 = vadd.f32 %v932_v58, %v835_v8  ;;  %v1555_v8 = vld [vmem:[#allocation12 + $0x8] sm:$0xff] }
 0x33d   :  { %1171 = vmatpush.bf16.msra.mxu3 %v1558_v5 }
 0x33e   :  { %v965_v61 = vadd.f32 %v2050_v22, %v933_v59 }
 0x340   :  { %v981_v0 = vmax.f32 %v965_v61, 0.0 }
 0x343   :  { %v934_v60 = vpop.f32.mrf.mxu1  ;;  %v1549_v49 = vld [vmem:[#allocation2 + $0x10] sm:$0xff] }
 0x344   :  { %v935_v62 = vadd.f32 %v934_v60, %v837_v54 }
 0x346   :  { %v966_v63 = vadd.f32 %v2050_v22, %v935_v62 }
 0x348   :  { %v982_v24 = vmax.f32 %v966_v63, 0.0 }
 0x34a   :  { %v1625_v1 = vpack.c.bf16 %v982_v24, %v981_v0 }
 0x34b   :  { %v937_v3 = vpop.f32.mrf.mxu1 }
 0x34c   :  { %1652 = vst [vmem:[#allocation2 + $0x8] sm:$0xff] %v1625_v1   ;;  %v938_v4 = vadd.f32 %v937_v3, %v840_v21 }
 0x34e   :  { %v967_v7 = vadd.f32 %v2050_v22, %v938_v4 }
 0x350   :  { %v983_v15 = vmax.f32 %v967_v7, 0.0 }
 0x353   :  { %v939_v6 = vpop.f32.mrf.mxu1  ;;  %v1550_v53 = vld [vmem:[#allocation2 + $0x8] sm:$0xff] }
 0x354   :  { %v940_v12 = vadd.f32 %v939_v6, %v842_v2 }
 0x356   :  { %v968_v14 = vadd.f32 %v2050_v22, %v940_v12 }
 0x358   :  { %v984_v16 = vmax.f32 %v968_v14, 0.0 }
 0x35a   :  { %v1630_v17 = vpack.c.bf16 %v984_v16, %v983_v15 }
 0x35b   :  { %v942_v19 = vpop.f32.mrf.mxu1 }
 0x35c   :  { %1653 = vst [vmem:[#allocation2 + $0x20] sm:$0xff] %v1630_v17   ;;  %v943_v25 = vadd.f32 %v942_v19, %v845_v13 }
 0x35e   :  { %v969_v28 = vadd.f32 %v2050_v22, %v943_v25 }
 0x360   :  { %v985_v31 = vmax.f32 %v969_v28, 0.0 }
 0x363   :  { %v944_v27 = vpop.f32.mrf.mxu1  ;;  %v1551_v52 = vld [vmem:[#allocation2 + $0x20] sm:$0xff] }
 0x364   :  { %v945_v29 = vadd.f32 %v944_v27, %v847_v20 }
 0x366   :  { %v970_v30 = vadd.f32 %v2050_v22, %v945_v29 }
 0x368   :  { %v986_v32 = vmax.f32 %v970_v30, 0.0 }
 0x36a   :  { %v1635_v34 = vpack.c.bf16 %v986_v32, %v985_v31 }
 0x36b   :  { %v947_v35 = vpop.f32.mrf.mxu1 }
 0x36c   :  { %1654 = vst [vmem:[#allocation2 + $0x28] sm:$0xff] %v1635_v34   ;;  %v948_v36 = vadd.f32 %v947_v35, %v850_v33 }
 0x36e   :  { %v971_v40 = vadd.f32 %v2050_v22, %v948_v36 }
 0x370   :  { %v987_v43 = vmax.f32 %v971_v40, 0.0 }
 0x373   :  { %v949_v39 = vpop.f32.mrf.mxu1  ;;  %v1552_v50 = vld [vmem:[#allocation2 + $0x28] sm:$0xff] }
 0x374   :  { %v950_v41 = vadd.f32 %v949_v39, %v852_v38 }
 0x376   :  { %v972_v42 = vadd.f32 %v2050_v22, %v950_v41  ;;  %v1557_v22 = vld [vmem:[#allocation12 + $0x18] sm:$0xff] }
 0x377   :  { %1172 = vmatpush.bf16.msra.mxu3 %v1557_v22 }
 0x378   :  { %v988_v44 = vmax.f32 %v972_v42, 0.0 }
 0x37a   :  { %v1640_v45 = vpack.c.bf16 %v988_v44, %v987_v43 }
 0x37b   :  { %1173 = vmatpush.bf16.msra.mxu3 %v1556_v37 }
 0x37c   :  { %1655 = vst [vmem:[#allocation2 + $0x38] sm:$0xff] %v1640_v45  }
 0x37f   :  { %1174 = vmatpush.bf16.msra.mxu3 %v1555_v8 }
 0x383   :  { %v1553_v46 = vld [vmem:[#allocation2 + $0x38] sm:$0xff]  ;;  %1175 = vmatpush.bf16.msra.mxu3 %v1554_v10 }
 0x384   :  { %1086 = vmatpush.bf16.msra.mxu2 %v1553_v46 }
 0x388   :  { %1087 = vmatpush.bf16.msra.mxu2 %v1552_v50 }
 0x38c   :  { %1088 = vmatpush.bf16.msra.mxu2 %v1551_v52 }
 0x390   :  { %1089 = vmatpush.bf16.msra.mxu2 %v1550_v53 }
 0x394   :  { %1090 = vmatpush.bf16.msra.mxu2 %v1549_v49 }
 0x398   :  { %1091 = vmatpush.bf16.msra.mxu2 %v1548_v26 }
 0x39c   :  { %1092 = vmatpush.bf16.msra.mxu2 %v1547_v9 }
 0x3a0   :  { %1093 = vmatpush.bf16.msra.mxu2 %v1546_v18 }
 0x3a3   :  { %1094 = vmatmul.bf16.vlgmr.msra.gmra.mxu2 %v1037_v11 }
 0x426   :  { %v1095_v23 = vpop.f32.mrf.mxu2 }
 0x427   :  { %v1099_v54 = vpack.c.bf16 %v1095_v23, %v1095_v23 }
 0x429   :  { %1176 = vmatmul.bf16.vlgmr.msra.gmra.mxu3 %v1099_v54 }
 0x42e   :  { %v1097_v55 = vpop.f32.mrf.mxu2 }
 0x4ac   :  { %v1177_v57 = vpop.f32.mrf.mxu3 }
 0x4ad   :  { %v1178_v58 = vadd.f32 %v1685_v56, %v1177_v57 }
 0x4af   :  { %1181 = vst [vmem:[#allocation14] sm:$0xff] %v1178_v58 }
 0x4b0   :  { %1192 = dma.vmem_to_hbm [thread:$0]  %s1188_s16, 128, %s1190_s1, [#allocation5]  }
 0x4b4   :  { %v1179_v59 = vpop.f32.mrf.mxu3 }
 0x4b5   :  { %1862 = dma.done.wait [#allocation5], 128  }
 0x4b6   :  { %1863 = vsyncadd [#allocation5], 4294967168 }
 0x4b7   :  { %1197 = vsyncpa [#allocation4], 1 }
 0x4b8   :  { %1198 = vsyncpa [#allocation7], 1 }
 0x4b9   :  { %1199 = vsyncpa [#allocation10], 1 }
 0x4ba   :  { %1200 = vsyncpa [#allocation13], 1 }
 0x4bb   :  { %1201 = vsyncpa [#allocation5], 1 }

</bundles_post_ra>
